<compile_context>
chip_gen: v7x
topology: tpu7x:2x2x1
jax: 0.10.0
libtpu: 0.0.40
codegen_flags: <defaults>
</compile_context>

<pallas_src>
import functools

import jax
import jax.numpy as jnp
from jax import lax
from jax.experimental import pallas as pl
from jax.experimental.pallas import tpu as pltpu


def _round_up(x: int, m: int) -> int:
    return ((x + m - 1) // m) * m


_VMEM_TABLE_BUDGET_BYTES = 16 * 2**20   # combined padded tables must fit VMEM (v7x-safe)
_MAX_ONEHOT_BYTES = 4 * 2**20           # cap per-tile (tb, rows) one-hot transient


def _fused_kernel(uidx_ref, iidx_ref, utab_ref, itab_ref, o_ref):
    # uidx_ref/iidx_ref: (tb, 1) int32 (VMEM); utab_ref/itab_ref: full tables (VMEM,
    # resident across grid steps); o_ref: (tb, 1) f32 packed per-example scores.
    uidx = uidx_ref[...]                                   # (tb, 1)
    iidx = iidx_ref[...]                                   # (tb, 1)
    tb = uidx.shape[0]
    nu = utab_ref.shape[0]
    ni = itab_ref.shape[0]
    # Exact gather via one-hot matmul on the MXU (0/1 weights, f32 accumulate).
    u_oh = (uidx == lax.broadcasted_iota(jnp.int32, (tb, nu), 1)).astype(utab_ref.dtype)
    i_oh = (iidx == lax.broadcasted_iota(jnp.int32, (tb, ni), 1)).astype(itab_ref.dtype)
    u = jnp.dot(u_oh, utab_ref[...], preferred_element_type=jnp.float32)   # (tb, D)
    v = jnp.dot(i_oh, itab_ref[...], preferred_element_type=jnp.float32)   # (tb, D)
    # VPU multiply + XLU lane-reduce, packed (tb, 1) output.
    o_ref[...] = jnp.sum(u * v, axis=-1, keepdims=True)


def _stream_kernel(u_ref, v_ref, o_ref):
    # Fallback path: pre-gathered (tb, D) rows streamed through VMEM.
    prod = u_ref[...].astype(jnp.float32) * v_ref[...].astype(jnp.float32)
    o_ref[...] = jnp.sum(prod, axis=-1, keepdims=True)


@functools.partial(jax.jit, static_argnames=("block_b",))
def rating_predict(user_emb, item_emb, user_indices, item_indices, *, block_b=1024):
    """Pallas equivalent of RatingPredictionModel.forward -> (B,) f32 ratings."""
    B = user_indices.shape[0]
    NU, D = user_emb.shape
    NI, Di = item_emb.shape
    assert Di == D

    tab_dtype = user_emb.dtype
    itemsize = jnp.dtype(tab_dtype).itemsize
    sub = max(8, 32 // itemsize)          # sublane multiple: 8 f32 / 16 bf16 / 32 int8

    # Clamp indices explicitly (PyTorch nn.Embedding would raise on OOB; clamping
    # keeps everything in-bounds and deterministic).
    uidx = jnp.clip(user_indices.astype(jnp.int32), 0, NU - 1)
    iidx = jnp.clip(item_indices.astype(jnp.int32), 0, NI - 1)

    nu_pad = _round_up(NU, 8)
    ni_pad = _round_up(NI, 8)
    table_bytes = (nu_pad + ni_pad) * D * itemsize
    fuse_gather = table_bytes <= _VMEM_TABLE_BUDGET_BYTES

    # Batch tile: multiple of `sub`, large (amortizes ~0.35us per-grid-step
    # overhead), but capped near ceil(B/2) so the grid has >= 2 steps when the
    # batch allows it (v7x dual-TensorCore split of the "parallel" axis).
    if B >= 2 * sub:
        tb = min(block_b, _round_up(pl.cdiv(B, 2), sub))
    else:
        tb = _round_up(max(B, 1), sub)
    if fuse_gather:
        # Keep the per-tile (tb, rows) one-hot transients modest.
        oh_cap = (_MAX_ONEHOT_BYTES // (max(nu_pad, ni_pad) * itemsize)) // sub * sub
        tb = min(tb, max(sub, oh_cap))
    tb = max(tb, sub)
    b_pad = _round_up(B, tb)
    grid = (b_pad // tb,)

    # Pad only the index vectors (B x 4 bytes) -- never the (B, D) slabs.
    if b_pad != B:
        uidx = jnp.pad(uidx, (0, b_pad - B))
        iidx = jnp.pad(iidx, (0, b_pad - B))

    if fuse_gather:
        u_tab, i_tab = user_emb, item_emb
        if nu_pad != NU:
            u_tab = jnp.pad(u_tab, ((0, nu_pad - NU), (0, 0)))
        if ni_pad != NI:
            i_tab = jnp.pad(i_tab, ((0, ni_pad - NI), (0, 0)))
        uidx2 = uidx.reshape(b_pad, 1)
        iidx2 = iidx.reshape(b_pad, 1)
        # VMEM budget: resident tables (x2 buffers worst case) + transients + margin,
        # capped below v7x's 64 MiB physical VMEM.
        vmem_limit = int(min(48 * 2**20, max(32 * 2**20, 2 * table_bytes + (8 << 20))))
        out = pl.pallas_call(
            _fused_kernel,
            grid=grid,
            in_specs=[
                pl.BlockSpec((tb, 1), lambda i: (i, 0)),
                pl.BlockSpec((tb, 1), lambda i: (i, 0)),
                pl.BlockSpec((nu_pad, D), lambda i: (0, 0)),   # same block every step -> resident
                pl.BlockSpec((ni_pad, D), lambda i: (0, 0)),
            ],
            out_specs=pl.BlockSpec((tb, 1), lambda i: (i, 0)),
            out_shape=jax.ShapeDtypeStruct((b_pad, 1), jnp.float32),
            compiler_params=pltpu.CompilerParams(
                dimension_semantics=("parallel",),
                vmem_limit_bytes=vmem_limit,
            ),
        )(uidx2, iidx2, u_tab, i_tab)
    else:
        # Large-table fallback: gather contiguous slabs outside the kernel.
        # TODO(synk): replace with in-kernel per-row DMA gather (pl.ANY + make_async_copy).
        u = jnp.take(user_emb, uidx, axis=0, mode="clip")
        v = jnp.take(item_emb, iidx, axis=0, mode="clip")
        out = pl.pallas_call(
            _stream_kernel,
            grid=grid,
            in_specs=[
                pl.BlockSpec((tb, D), lambda i: (i, 0)),
                pl.BlockSpec((tb, D), lambda i: (i, 0)),
            ],
            out_specs=pl.BlockSpec((tb, 1), lambda i: (i, 0)),
            out_shape=jax.ShapeDtypeStruct((b_pad, 1), jnp.float32),
            compiler_params=pltpu.CompilerParams(
                dimension_semantics=("parallel",)),
        )(u, v)

    # ratings_pred: (B,) -- padded tail rows are discarded here.
    return out[:B, 0]


if __name__ == "__main__":
    # Deterministic parameter init (nn.Embedding default ~ N(0, 1)) and inputs.
    key = jax.random.PRNGKey(0)
    k_u, k_i, k_ui, k_ii = jax.random.split(key, 4)

    num_users, num_items, embedding_dim, batch = 64, 96, 128, 8
    user_emb = jax.random.normal(k_u, (num_users, embedding_dim), dtype=jnp.float32)
    item_emb = jax.random.normal(k_i, (num_items, embedding_dim), dtype=jnp.float32)
    user_indices = jax.random.randint(k_ui, (batch,), 0, num_users, dtype=jnp.int32)
    item_indices = jax.random.randint(k_ii, (batch,), 0, num_items, dtype=jnp.int32)

    # Small-batch path (single tile, fused in-kernel gather).
    ratings = rating_predict(user_emb, item_emb, user_indices, item_indices)
    ratings = jax.block_until_ready(ratings)
    ref = jnp.sum(user_emb[user_indices] * item_emb[item_indices], axis=1)
    assert ratings.shape == (batch,)
    assert jnp.allclose(ratings, ref, atol=1e-4, rtol=1e-4)

    # Multi-tile path (>= 2 grid steps + ragged index-only padding): B=300.
    big_b = 300
    k_ui2, k_ii2 = jax.random.split(k_ui)
    ui2 = jax.random.randint(k_ui2, (big_b,), 0, num_users, dtype=jnp.int32)
    ii2 = jax.random.randint(k_ii2, (big_b,), 0, num_items, dtype=jnp.int32)
    ratings2 = jax.block_until_ready(
        rating_predict(user_emb, item_emb, ui2, ii2, block_b=128))
    ref2 = jnp.sum(user_emb[ui2] * item_emb[ii2], axis=1)
    assert ratings2.shape == (big_b,)
    assert jnp.allclose(ratings2, ref2, atol=1e-4, rtol=1e-4)

    # bf16 tables (halves gather/stream HBM traffic; biggest relative win on v5e);
    # the gather is exact and accumulation stays f32 in the kernel.
    ue16, ie16 = user_emb.astype(jnp.bfloat16), item_emb.astype(jnp.bfloat16)
    ratings3 = jax.block_until_ready(rating_predict(ue16, ie16, ui2, ii2))
    ref3 = jnp.sum(ue16[ui2].astype(jnp.float32) * ie16[ii2].astype(jnp.float32), axis=1)
    assert jnp.allclose(ratings3, ref3, atol=1e-2, rtol=1e-2)

    print("KERNEL_OK")
</pallas_src>

<mosaic_0001>
module attributes {stable_mosaic.version = 11 : i64} {
  func.func @_fused_kernel(%arg0: i32, %arg1: memref<8x1xi32, #tpu.memory_space<vmem>>, %arg2: memref<8x1xi32, #tpu.memory_space<vmem>>, %arg3: memref<64x128xf32, #tpu.memory_space<vmem>>, %arg4: memref<96x128xf32, #tpu.memory_space<vmem>>, %arg5: memref<8x1xf32, #tpu.memory_space<vmem>>) attributes {dimension_semantics = [#tpu.dimension_semantics<parallel>], iteration_bounds = array<i64: 1>, scalar_prefetch = 0 : i64, scratch_operands = 0 : i64, tpu.core_type = #tpu.core_type<tc>, window_params = [{transform_indices = @transform_0, window_bounds = array<i64: 8, 1>}, {transform_indices = @transform_1, window_bounds = array<i64: 8, 1>}, {pipeline_mode = #tpu.pipeline_mode<synchronous>, transform_indices = @transform_2, window_bounds = array<i64: 64, 128>}, {pipeline_mode = #tpu.pipeline_mode<synchronous>, transform_indices = @transform_3, window_bounds = array<i64: 96, 128>}, {transform_indices = @transform_4, window_bounds = array<i64: 8, 1>}]} {
    %c0 = arith.constant 0 : index
    %c0_0 = arith.constant 0 : index
    %0 = vector.load %arg1[%c0, %c0_0] : memref<8x1xi32, #tpu.memory_space<vmem>>, vector<8x1xi32>
    %c0_1 = arith.constant 0 : index
    %c0_2 = arith.constant 0 : index
    %1 = vector.load %arg2[%c0_1, %c0_2] : memref<8x1xi32, #tpu.memory_space<vmem>>, vector<8x1xi32>
    %2 = tpu.iota {dimensions = array<i32: 1>} : vector<8x64xi32>
    %3 = vector.broadcast %0 : vector<8x1xi32> to vector<8x64xi32>
    %4 = arith.cmpi eq, %3, %2 : vector<8x64xi32>
    %5 = arith.extui %4 : vector<8x64xi1> to vector<8x64xi32>
    %6 = arith.sitofp %5 : vector<8x64xi32> to vector<8x64xf32>
    %7 = tpu.iota {dimensions = array<i32: 1>} : vector<8x96xi32>
    %8 = vector.broadcast %1 : vector<8x1xi32> to vector<8x96xi32>
    %9 = arith.cmpi eq, %8, %7 : vector<8x96xi32>
    %10 = arith.extui %9 : vector<8x96xi1> to vector<8x96xi32>
    %11 = arith.sitofp %10 : vector<8x96xi32> to vector<8x96xf32>
    %c0_3 = arith.constant 0 : index
    %c0_4 = arith.constant 0 : index
    %12 = vector.load %arg3[%c0_3, %c0_4] : memref<64x128xf32, #tpu.memory_space<vmem>>, vector<64x128xf32>
    %cst = arith.constant dense<0.000000e+00> : vector<8x128xf32>
    %13 = tpu.matmul %6, %12, %cst {dimension_numbers = #tpu.dot_dimension_numbers<[1], [0], [0], [1], [0, 0, 1, 1], [], []>} : vector<8x64xf32>, vector<64x128xf32>, vector<8x128xf32> -> vector<8x128xf32>
    %c0_5 = arith.constant 0 : index
    %c0_6 = arith.constant 0 : index
    %14 = vector.load %arg4[%c0_5, %c0_6] : memref<96x128xf32, #tpu.memory_space<vmem>>, vector<96x128xf32>
    %cst_7 = arith.constant dense<0.000000e+00> : vector<8x128xf32>
    %15 = tpu.matmul %11, %14, %cst_7 {dimension_numbers = #tpu.dot_dimension_numbers<[1], [0], [0], [1], [0, 0, 1, 1], [], []>} : vector<8x96xf32>, vector<96x128xf32>, vector<8x128xf32> -> vector<8x128xf32>
    %16 = arith.mulf %13, %15 : vector<8x128xf32>
    %cst_8 = arith.constant dense<0.000000e+00> : vector<8xf32>
    %17 = vector.multi_reduction <add>, %16, %cst_8 [1] : vector<8x128xf32> to vector<8xf32>
    %18 = vector.shape_cast %17 : vector<8xf32> to vector<8x1xf32>
    %c0_9 = arith.constant 0 : index
    %c0_10 = arith.constant 0 : index
    %19 = vector.load %arg5[%c0_9, %c0_10] : memref<8x1xf32, #tpu.memory_space<vmem>>, vector<8x1xf32>
    tpu.vector_store %arg5[%c0_9, %c0_10], %18 {strides = array<i32>} : memref<8x1xf32, #tpu.memory_space<vmem>>, vector<8x1xf32>,
    return
  }
  func.func @transform_0(%arg0: i32) -> (i32, i32) {
    %c0_i32 = arith.constant 0 : i32
    %c0_i32_0 = arith.constant 0 : i32
    return %arg0, %c0_i32 : i32, i32
  }
  func.func @transform_1(%arg0: i32) -> (i32, i32) {
    %c0_i32 = arith.constant 0 : i32
    %c0_i32_0 = arith.constant 0 : i32
    return %arg0, %c0_i32 : i32, i32
  }
  func.func @transform_2(%arg0: i32) -> (i32, i32) {
    %c0_i32 = arith.constant 0 : i32
    %c0_i32_0 = arith.constant 0 : i32
    %c0_i32_1 = arith.constant 0 : i32
    return %c0_i32, %c0_i32_0 : i32, i32
  }
  func.func @transform_3(%arg0: i32) -> (i32, i32) {
    %c0_i32 = arith.constant 0 : i32
    %c0_i32_0 = arith.constant 0 : i32
    %c0_i32_1 = arith.constant 0 : i32
    return %c0_i32, %c0_i32_0 : i32, i32
  }
  func.func @transform_4(%arg0: i32) -> (i32, i32) {
    %c0_i32 = arith.constant 0 : i32
    %c0_i32_0 = arith.constant 0 : i32
    return %arg0, %c0_i32 : i32, i32
  }
}

</mosaic_0001>

<bundles_post_ra>
// kernel: rating_predict.1
= control target key start
LH: loop header
LB: loop body
LE: loop exit
PB: predicated region body
PF: predicated region fallthrough
CT: control target
= control target key end

     0   :  { %9 = vsyncpa [#allocation3], 0  ;;  %s465_s0 = inlined_call_operand.vmem [shape: s32[8,1], index: 0, kind: input, shape index: {}]   ;;  %s466_s1 = inlined_call_operand.vmem [shape: s32[8,1], index: 1, kind: input, shape index: {}]   ;;  %s467_s2 = inlined_call_operand.hbm [shape: f32[64,128], index: 2, kind: input, shape index: {}]   ;;  %s468_s3 = inlined_call_operand.hbm [shape: f32[96,128], index: 3, kind: input, shape index: {}]   ;;  %s469_s4 = inlined_call_operand.vmem [shape: f32[8,1], index: 4, kind: output, shape index: {}]  }
   0x1   :  { %10 = vsyncpa [#allocation5], 0  ;;  %s399_s15 = smov [#allocation2]   ;;  %s351_s19 = scalar_lea.hbm %s467_s2, 1024 }
   0x2   :  { %s20_s16 = sshll.u32 %s399_s15, 4  ;;  %p352_p0 = scmp.ne.s32.totalorder %s467_s2, %s351_s19  ;;  %s21_s16 = int_to_ptr.vmem [resolvable:$true] %s20_s16 }
   0x3   :  { %p355_p1 = scmp.lt.u32.totalorder %s351_s19, %s467_s2 }
   0x5   :  { %p357_p2 = pnand %p355_p1, %p352_p0 }
   0x7   :  { %360 = shalt.err (!%p357_p2)
}
   0x8   :  { %s361_s24 = scalar_lea.vmem %s21_s16, 1024  ;;  %p366_p4 = scmp.lt.s32.totalorder %s21_s16, %s21_s16 }
   0x9   :  { %p362_p3 = scmp.ne.s32.totalorder %s21_s16, %s361_s24  ;;  %p367_p5 = scmp.lt.s32.totalorder %s361_s24, %s361_s24 }
   0xb   :  { %p368_p6 = por %p367_p5, %p366_p4 }
   0xd   :  { %p369_p7 = pnand %p368_p6, %p362_p3 }
   0xf   :  { %372 = shalt.err (!%p369_p7)
}
  0x10   :  { %s400_s25 = smov 128   ;;  %s401_s26 = smov 8  }
  0x11   :  { %26 = dma.hbm_to_vmem [thread:$0]  %s467_s2, 1024, %s21_s16, [#allocation3], %s400_s25, %s400_s25, %s401_s26  }
  0x12   :  { %s402_s29 = smov [#allocation4]   ;;  %s373_s7 = scalar_lea.hbm %s468_s3, 1536 }
  0x13   :  { %s32_s30 = sshll.u32 %s402_s29, 4  ;;  %p374_p8 = scmp.ne.s32.totalorder %s468_s3, %s373_s7  ;;  %s33_s30 = int_to_ptr.vmem [resolvable:$true] %s32_s30 }
  0x14   :  { %p377_p9 = scmp.lt.u32.totalorder %s373_s7, %s468_s3 }
  0x16   :  { %p379_p10 = pnand %p377_p9, %p374_p8 }
  0x18   :  { %382 = shalt.err (!%p379_p10)
}
  0x19   :  { %s383_s12 = scalar_lea.vmem %s33_s30, 1536  ;;  %p388_p12 = scmp.lt.s32.totalorder %s33_s30, %s33_s30 }
  0x1a   :  { %p384_p11 = scmp.ne.s32.totalorder %s33_s30, %s383_s12  ;;  %p389_p13 = scmp.lt.s32.totalorder %s383_s12, %s383_s12 }
  0x1c   :  { %p390_p0 = por %p389_p13, %p388_p12 }
  0x1e   :  { %p391_p1 = pnand %p390_p0, %p384_p11 }
  0x20   :  { %394 = shalt.err (!%p391_p1)
}
  0x21   :  { %38 = dma.hbm_to_vmem [thread:$0]  %s468_s3, 1536, %s33_s30, [#allocation5], %s400_s25, %s400_s25, %s401_s26  }
  0x22   :  { %395 = dma.done.wait [#allocation3], 1024  }
  0x23   :  { %396 = vsyncadd [#allocation3], 4294966272 }
  0x24   :  { %397 = dma.done.wait [#allocation5], 1536  }
  0x25   :  { %398 = vsyncadd [#allocation5], 4294965760  ;;  %v403_v0 = vmov 0   ;;  %v404_v1 = vmov 0.0|0.0   ;;  %v45_v2 = vld [vmem:[%s465_s0] sm:$0xff]  ;;  %v144_v5 = vld [vmem:[#allocation4 + $0x8] sm:$0xff]  ;;  %v47_v35 = vlaneseq }
  0x26   :  { %350 = vset.pattern.permute.xlu0 %v403_v0  ;;  %324 = vmatprep.subr.bf16.mxu1 %v404_v1  ;;  %v46_v3 = vld [vmem:[%s466_s1] sm:$0xff]  ;;  %v62_v7 = vld [vmem:[#allocation2 + $0x8] sm:$0xff]  ;;  %v145_v10 = vld [vmem:[#allocation4 + $0x10] sm:$0xff]  ;;  %vm405_vm0 = vmmov 0   ;;  %v406_v13 = vmov 0.0   ;;  %vm69_vm1 = vcmask 523264  }
  0x27   :  { %312 = vmatprep.subr.bf16.mxu0 %v404_v1  ;;  %v143_v4 = vld [vmem:[#allocation4] sm:$0xff]  ;;  %50 = vperm.xlu0 %350, %v45_v2   ;;  %v146_v11 = vld [vmem:[#allocation4 + $0x18] sm:$0xff]  ;;  %v63_v12 = vld [vmem:[#allocation2 + $0x10] sm:$0xff]  ;;  %v48_v36 = vand.u32 127, %v47_v35  ;;  %vm155_vm3 = vcmask 785408   ;;  %vm232_vm5 = vcmask 7168  }
  0x28   :  { %v61_v6 = vld [vmem:[#allocation2] sm:$0xff]  ;;  %v325_v8 = vpack.c.bf16 %v144_v5, %v143_v4  ;;  %282 = vmatprep.mubr.msk.f32.mxu0 %vm405_vm0, %v406_v13  ;;  %309 = vmatprep.mubr.msk.f32.mxu1 %vm405_vm0, %v406_v13  ;;  %v64_v14 = vld [vmem:[#allocation2 + $0x18] sm:$0xff]  ;;  %v328_v15 = vpack.c.bf16 %v146_v11, %v145_v10  ;;  %v148_v18 = vld [vmem:[#allocation4 + $0x28] sm:$0xff] }
  0x29   :  { %v313_v9 = vpack.c.bf16 %v62_v7, %v61_v6  ;;  %v316_v16 = vpack.c.bf16 %v64_v14, %v63_v12  ;;  %v147_v17 = vld [vmem:[#allocation4 + $0x20] sm:$0xff]  ;;  %v66_v20 = vld [vmem:[#allocation2 + $0x28] sm:$0xff]  ;;  %v149_v23 = vld [vmem:[#allocation4 + $0x30] sm:$0xff] }
  0x2a   :  { %326 = vmatpush3.bf16.msra.mxu1 %v325_v8  ;;  %v65_v19 = vld [vmem:[#allocation2 + $0x20] sm:$0xff]  ;;  %v331_v21 = vpack.c.bf16 %v148_v18, %v147_v17  ;;  %v150_v24 = vld [vmem:[#allocation4 + $0x38] sm:$0xff]  ;;  %v67_v25 = vld [vmem:[#allocation2 + $0x30] sm:$0xff] }
  0x2b   :  { %314 = vmatpush3.bf16.msra.mxu0 %v313_v9  ;;  %56 = vperm.xlu0 %350, %v46_v3   ;;  %v319_v22 = vpack.c.bf16 %v66_v20, %v65_v19  ;;  %v68_v26 = vld [vmem:[#allocation2 + $0x38] sm:$0xff]  ;;  %v334_v27 = vpack.c.bf16 %v150_v24, %v149_v23  ;;  %v151_v29 = vld [vmem:[#allocation4 + $0x40] sm:$0xff]  ;;  %v152_v30 = vld [vmem:[#allocation4 + $0x48] sm:$0xff] }
  0x2c   :  { %327 = vmatprep.subr.bf16.mxu1 %v404_v1  ;;  %315 = vmatprep.subr.bf16.mxu0 %v404_v1  ;;  %v322_v28 = vpack.c.bf16 %v68_v26, %v67_v25  ;;  %v337_v31 = vpack.c.bf16 %v152_v30, %v151_v29  ;;  %v153_v32 = vld [vmem:[#allocation4 + $0x50] sm:$0xff]  ;;  %v154_v33 = vld [vmem:[#allocation4 + $0x58] sm:$0xff] }
  0x2d   :  { %v340_v34 = vpack.c.bf16 %v154_v33, %v153_v32 }
  0x2e   :  { %329 = vmatpush3.bf16.msra.mxu1 %v328_v15 }
  0x2f   :  { %317 = vmatpush3.bf16.msra.mxu0 %v316_v16  ;;  %330 = vmatprep.subr.bf16.mxu1 %v404_v1 }
  0x30   :  { %318 = vmatprep.subr.bf16.mxu0 %v404_v1 }
  0x32   :  { %332 = vmatpush3.bf16.msra.mxu1 %v331_v21 }
  0x33   :  { %320 = vmatpush3.bf16.msra.mxu0 %v319_v22  ;;  %333 = vmatprep.subr.bf16.mxu1 %v404_v1 }
  0x34   :  { %321 = vmatprep.subr.bf16.mxu0 %v404_v1 }
  0x36   :  { %335 = vmatpush3.bf16.msra.mxu1 %v334_v27 }
  0x37   :  { %323 = vmatpush3.bf16.msra.mxu0 %v322_v28  ;;  %336 = vmatprep.subr.bf16.mxu1 %v404_v1 }
  0x3a   :  { %338 = vmatpush3.bf16.msra.mxu1 %v337_v31 }
  0x3b   :  { %339 = vmatprep.subr.bf16.mxu1 %v404_v1 }
  0x3e   :  { %341 = vmatpush3.bf16.msra.mxu1 %v340_v34 }
  0xa6   :  { %v51_v37 = vpop.permute.xlu0 %50 }
  0xa7   :  { %vm52_vm2 = vcmp.eq.s32.totalorder %v51_v37, %v48_v36 }
  0xa8   :  { %v240_v38 = vsel %vm52_vm2, 1.0, %v406_v13 }
  0xa9   :  { %283 = vmatmul.mubr.msk.f32.vlgmr.msra.gmra.mrb[0].mxu0 %vm69_vm1, %v240_v38 }
  0xaa   :  { %v57_v39 = vpop.permute.xlu0 %56 }
  0xab   :  { %vm58_vm4 = vcmp.eq.s32.totalorder %v57_v39, %v48_v36 }
  0xac   :  { %v241_v40 = vsel %vm58_vm4, 1.0, %v406_v13 }
  0xad   :  { %310 = vmatmul.mubr.msk.f32.vlgmr.msra.gmra.mrb[0].mxu1 %vm155_vm3, %v241_v40 }
 0x17c   :  { %v139_v41 = vpop.f32.mrb[0].mxu0 }
 0x17d   :  { %v284_v42 = vpop.f32.mrb[1].mxu0 }
 0x180   :  { %v225_v43 = vpop.f32.mrb[0].mxu1 }
 0x181   :  { %v311_v44 = vpop.f32.mrb[1].mxu1  ;;  %v229_v45 = vmul.f32 %v225_v43, %v139_v41 }
 0x183   :  { %230 = vadd.xlane.f32.xlu1 %v229_v45 }
 0x210   :  { %v231_v46 = vpop.xlane.xlu1 %230 }
 0x211   :  { %233 = vst.msk [vmem:[%s469_s4] sm:$0xff] %vm232_vm5, %v231_v46 }
 0x212   :  { %238 = vsyncpa [#allocation3], 1 }
 0x213   :  { %239 = vsyncpa [#allocation5], 1 }

</bundles_post_ra>
